<compile_context>
chip_gen: v6e
topology: v6e:2x2x1
jax: 0.10.0
libtpu: 0.0.40
codegen_flags: <defaults>
</compile_context>

<pallas_src>
import functools

import jax
import jax.numpy as jnp
from jax.experimental import pallas as pl
from jax.experimental.pallas import tpu as pltpu


def _flnssm_decoupling_kernel(
    uxz_ref,      # (IN+2S, Bb)  feature-major slab: rows [u; x; z]
    w_first_ref,  # (2H, S)      [w_alpha_in ; w_beta_in], original [out, in] layout
    bias_ref,     # (2H + L*H + IN*IN, 1) packed column biases
    w_hid_ref,    # (max(L,1), H, H)
    w_aout_ref,   # (IN, H)      alpha_out (bias-free)
    w_bout_ref,   # (IN*IN, H)   beta second linear
    t_rep_ref,    # (IN*IN, IN)  constant 0/1 lane-replication matrix (row i*IN+j -> e_j)
    w_tail_ref,   # (S+OUT, S+IN*IN) = [[A | repeat(B, IN, axis=1)], [C | 0]]
    out_ref,      # (S+OUT, Bb)  -> [dz; y]
    *,
    n_hid_layers: int,
    input_dim: int,
    state_dim: int,
    hidden_dim: int,
):
    f32 = jnp.float32
    IN, S, H = input_dim, state_dim, hidden_dim
    L = n_hid_layers - 1

    uxz = uxz_ref[...]
    u = uxz[0:IN, :]
    x = uxz[IN:IN + S, :]
    z = uxz[IN + S:IN + 2 * S, :]

    # ---- merged first layer (alpha_in and BetaLayer's first linear): one matmul,
    #      one tanh, aligned sublane split.
    h0 = jnp.tanh(jnp.dot(w_first_ref[...], x, preferred_element_type=f32)
                  + bias_ref[0:2 * H, :])
    a = h0[0:H, :]
    g = h0[H:2 * H, :]

    # ---- alpha hidden stack (statically unrolled)
    for k in range(L):
        a = jnp.tanh(jnp.dot(w_hid_ref[k], a, preferred_element_type=f32)
                     + bias_ref[2 * H + k * H: 2 * H + (k + 1) * H, :])

    alpha = jnp.dot(w_aout_ref[...], a, preferred_element_type=f32)          # (IN, Bb)
    beta_flat = (jnp.dot(w_bout_ref[...], g, preferred_element_type=f32)
                 + bias_ref[2 * H + L * H:, :])                              # (IN*IN, Bb)

    # ---- batched mat-vec beta(x) @ (u + alpha) without reshapes / XLU reductions:
    #   v_rep[i*IN+j, b] = v[j, b]   (lane-constant replication via constant matmul)
    #   prod[i*IN+j, b]  = beta[b, i, j] * v[j, b]
    # the sum over j and the B matmul are folded into w_tail below.
    v = u + alpha
    v_rep = jnp.dot(t_rep_ref[...], v, preferred_element_type=f32)
    prod = beta_flat * v_rep

    # ---- fused tail: [dz; y] = W_tail @ [z; prod]   (single matmul, K = S + IN*IN)
    zp = jnp.concatenate([z, prod], axis=0)
    out = jnp.dot(w_tail_ref[...], zp, preferred_element_type=f32)
    out_ref[...] = out.astype(out_ref.dtype)


def prepare_kernel_params(params, *, input_dim, state_dim, output_dim, n_hid_layers):
    """One-time weight preprocessing (per parameter update, NOT per forward step).
    Weights keep their PyTorch [out, in] layout (feature-major kernel computes W @ X);
    the two x-fed first layers are merged, all biases are packed into one column slab,
    and the fused tail / replication matrices are built here."""
    IN, S, OUT = input_dim, state_dim, output_dim
    f32 = jnp.float32
    H = params["w_ain"].shape[0]
    L = n_hid_layers - 1

    w_first = jnp.concatenate([params["w_ain"], params["w_bin"]], axis=0).astype(f32)  # (2H, S)

    if L > 0:
        w_hid = params["w_hid"][:L].astype(f32)                       # (L, H, H)
        b_hid_flat = params["b_hid"][:L].reshape(L * H).astype(f32)
    else:
        w_hid = jnp.zeros((1, H, H), f32)                             # dummy, unused
        b_hid_flat = jnp.zeros((0,), f32)

    bias = jnp.concatenate(
        [params["b_ain"].astype(f32), params["b_bin"].astype(f32),
         b_hid_flat, params["b_bout"].astype(f32)]
    ).reshape(-1, 1)                                                  # (2H + L*H + IN*IN, 1)

    # W_pB[s, i*IN + j] = B[s, i]  ==  repeat(B, IN, axis=1)
    w_pB = jnp.repeat(params["w_B"].astype(f32), IN, axis=1)          # (S, IN*IN)
    w_tail_top = jnp.concatenate([params["w_A"].astype(f32), w_pB], axis=1)
    w_tail_bot = jnp.concatenate(
        [params["w_C"].astype(f32), jnp.zeros((OUT, IN * IN), f32)], axis=1)
    w_tail = jnp.concatenate([w_tail_top, w_tail_bot], axis=0)        # (S+OUT, S+IN*IN)

    return {
        "w_first": w_first,                                           # (2H, S)
        "bias": bias,                                                 # (2H+L*H+IN*IN, 1)
        "w_hid": w_hid,                                               # (max(L,1), H, H)
        "w_aout": params["w_aout"].astype(f32),                       # (IN, H)
        "w_bout": params["w_bout"].astype(f32),                       # (IN*IN, H)
        "t_rep": jnp.tile(jnp.eye(IN, dtype=f32), (IN, 1)),           # (IN*IN, IN)
        "w_tail": w_tail,                                             # (S+OUT, S+IN*IN)
    }


def _pick_block_b(B, cap=4096):
    """Largest 128-multiple divisor of B that is <= min(cap, B//2) (so the 'parallel'
    batch axis has >= 2 grid steps and can shard across v7x's two TensorCores);
    otherwise a single full-batch block (still valid for any B)."""
    target = min(cap, B // 2)
    blk = (target // 128) * 128
    while blk >= 128:
        if B % blk == 0:
            return blk
        blk -= 128
    return B


def flnssm_decoupling_forward(inp, state, kparams, *, input_dim, state_dim,
                              output_dim, n_hid_layers):
    """inp: (B, input_dim + state_dim), state: (B, state_dim) -> (dz, y)."""
    B = inp.shape[0]
    IN, S, OUT = input_dim, state_dim, output_dim
    H = kparams["w_aout"].shape[1]
    L = n_hid_layers - 1
    assert IN == S, "FLNSSM_decoupling requires input_dim == state_dim (u + alpha)"
    assert state.shape == (B, S)

    # Feature-major boundary: one (IN+2S, B) slab [u; x; z] so batch lands on lanes.
    uxz = jnp.concatenate([inp, state], axis=1).astype(jnp.float32).T   # (IN+2S, B)
    F_in = IN + 2 * S

    block_b = _pick_block_b(B)
    nb = B // block_b

    kernel = functools.partial(
        _flnssm_decoupling_kernel,
        n_hid_layers=n_hid_layers, input_dim=IN, state_dim=S, hidden_dim=H,
    )

    def full_spec(shape):
        n = len(shape)
        return pl.BlockSpec(shape, lambda b, n=n: (0,) * n)

    w_order = ("w_first", "bias", "w_hid", "w_aout", "w_bout", "t_rep", "w_tail")
    weights = [kparams[k] for k in w_order]

    # Advisory cost estimate (helps XLA schedule around the custom call).
    flops_per_elem = (
        2 * (2 * H) * S                       # merged first layer
        + L * 2 * H * H                       # alpha hidden stack
        + 2 * IN * H                          # alpha_out
        + 2 * (IN * IN) * H                   # beta_out
        + 2 * (IN * IN) * IN                  # lane replication matmul
        + 2 * (S + OUT) * (S + IN * IN)       # fused tail
    )
    cost = pl.CostEstimate(
        flops=int(B * flops_per_elem),
        transcendentals=int(B * (2 * H + L * H)),
        bytes_accessed=int(4 * (B * (F_in + S + OUT)
                                + sum(int(w.size) for w in weights))),
    )

    out = pl.pallas_call(
        kernel,
        out_shape=jax.ShapeDtypeStruct((S + OUT, B), jnp.float32),
        grid=(nb,),
        in_specs=[pl.BlockSpec((F_in, block_b), lambda b: (0, b))]
                 + [full_spec(w.shape) for w in weights],
        out_specs=pl.BlockSpec((S + OUT, block_b), lambda b: (0, b)),
        compiler_params=pltpu.CompilerParams(dimension_semantics=("parallel",)),
        cost_estimate=cost,
    )(uxz, *weights)

    dz = out[:S, :].T
    y = out[S:, :].T
    return dz, y


def make_params(key, *, input_dim, hidden_dim, state_dim, output_dim, n_hid_layers):
    """Deterministic synthetic parameters, PyTorch nn.Linear layout [out, in]."""
    ks = jax.random.split(key, 12)
    L = max(n_hid_layers - 1, 1)

    def init(k, shape, scale=0.1):
        return (scale * jax.random.normal(k, shape)).astype(jnp.float32)

    return {
        # alpha_in: Linear(state_dim -> hidden_dim)
        "w_ain": init(ks[0], (hidden_dim, state_dim)),
        "b_ain": init(ks[1], (hidden_dim,)),
        # alpha_hid: (n_hid_layers - 1) x Linear(hidden_dim -> hidden_dim) + tanh
        "w_hid": init(ks[2], (L, hidden_dim, hidden_dim)),
        "b_hid": init(ks[3], (L, hidden_dim)),
        # alpha_out: Linear(hidden_dim -> state_dim), bias=False.  The module
        # zero-initializes it; use non-zero values here so the test exercises the path.
        "w_aout": init(ks[4], (state_dim, hidden_dim)),
        # BetaLayer: Linear(state_dim -> hidden_dim) + tanh, Linear(hidden_dim -> IN*IN)
        "w_bin": init(ks[5], (hidden_dim, state_dim)),
        "b_bin": init(ks[6], (hidden_dim,)),
        "w_bout": init(ks[7], (input_dim * input_dim, hidden_dim)),
        "b_bout": init(ks[8], (input_dim * input_dim,)),
        # linmod: A (S,S), B (S,IN), C (OUT,S), all bias-free
        "w_A": init(ks[9], (state_dim, state_dim)),
        "w_B": init(ks[10], (state_dim, input_dim)),
        "w_C": init(ks[11], (output_dim, state_dim)),
    }


def _reference_forward(inp, state, params, *, input_dim, state_dim, n_hid_layers):
    """Plain-JAX mirror of the PyTorch forward, for correctness checking."""
    IN, S = input_dim, state_dim
    u = inp[:, :IN]
    x = inp[:, IN:IN + S]
    z = state
    a = jnp.tanh(x @ params["w_ain"].T + params["b_ain"])
    for k in range(n_hid_layers - 1):
        a = jnp.tanh(a @ params["w_hid"][k].T + params["b_hid"][k])
    alpha = a @ params["w_aout"].T
    g = jnp.tanh(x @ params["w_bin"].T + params["b_bin"])
    beta = (g @ params["w_bout"].T + params["b_bout"]).reshape(-1, IN, IN)
    v = u + alpha
    input_lin = jnp.einsum("bij,bj->bi", beta, v)
    dz = z @ params["w_A"].T + input_lin @ params["w_B"].T
    y = z @ params["w_C"].T
    return dz, y


def _run_case(batch, *, input_dim, state_dim, hidden_dim, output_dim, n_hid_layers, seed):
    key = jax.random.PRNGKey(seed)
    k_inp, k_state, k_par = jax.random.split(key, 3)
    inp = jax.random.normal(k_inp, (batch, input_dim + state_dim), jnp.float32)
    state = jax.random.normal(k_state, (batch, state_dim), jnp.float32)
    params = make_params(
        k_par, input_dim=input_dim, hidden_dim=hidden_dim, state_dim=state_dim,
        output_dim=output_dim, n_hid_layers=n_hid_layers,
    )
    kparams = prepare_kernel_params(
        params, input_dim=input_dim, state_dim=state_dim, output_dim=output_dim,
        n_hid_layers=n_hid_layers,
    )
    dz, y = flnssm_decoupling_forward(
        inp, state, kparams,
        input_dim=input_dim, state_dim=state_dim, output_dim=output_dim,
        n_hid_layers=n_hid_layers,
    )
    jax.block_until_ready((dz, y))
    dz_ref, y_ref = _reference_forward(
        inp, state, params,
        input_dim=input_dim, state_dim=state_dim, n_hid_layers=n_hid_layers,
    )
    assert dz.shape == (batch, state_dim) and y.shape == (batch, output_dim)
    assert jnp.allclose(dz, dz_ref, atol=1e-5, rtol=1e-5), float(jnp.max(jnp.abs(dz - dz_ref)))
    assert jnp.allclose(y, y_ref, atol=1e-5, rtol=1e-5), float(jnp.max(jnp.abs(y - y_ref)))


if __name__ == "__main__":
    # Small, module-consistent shapes (input_dim must equal state_dim, see above).
    common = dict(input_dim=8, state_dim=8, hidden_dim=32, output_dim=4, n_hid_layers=3)
    # Tiny batch: single full-batch block (block_b == B path).
    _run_case(8, seed=0, **common)
    # Larger batch: exercises the tiled (128-lane) path with >= 2 parallel grid steps.
    _run_case(256, seed=1, **common)
    print("KERNEL_OK")
</pallas_src>

<mosaic_0001>
module attributes {stable_mosaic.version = 11 : i64} {
  func.func @_flnssm_decoupling_kernel(%arg0: i32, %arg1: memref<24x8xf32, #tpu.memory_space<vmem>>, %arg2: memref<64x8xf32, #tpu.memory_space<vmem>>, %arg3: memref<192x1xf32, #tpu.memory_space<vmem>>, %arg4: memref<2x32x32xf32, #tpu.memory_space<vmem>>, %arg5: memref<8x32xf32, #tpu.memory_space<vmem>>, %arg6: memref<64x32xf32, #tpu.memory_space<vmem>>, %arg7: memref<64x8xf32, #tpu.memory_space<vmem>>, %arg8: memref<12x72xf32, #tpu.memory_space<vmem>>, %arg9: memref<12x8xf32, #tpu.memory_space<vmem>>) attributes {dimension_semantics = [#tpu.dimension_semantics<parallel>], iteration_bounds = array<i64: 1>, scalar_prefetch = 0 : i64, scratch_operands = 0 : i64, tpu.core_type = #tpu.core_type<tc>, window_params = [{transform_indices = @transform_0, window_bounds = array<i64: 24, 8>}, {pipeline_mode = #tpu.pipeline_mode<synchronous>, transform_indices = @transform_1, window_bounds = array<i64: 64, 8>}, {pipeline_mode = #tpu.pipeline_mode<synchronous>, transform_indices = @transform_2, window_bounds = array<i64: 192, 1>}, {pipeline_mode = #tpu.pipeline_mode<synchronous>, transform_indices = @transform_3, window_bounds = array<i64: 2, 32, 32>}, {pipeline_mode = #tpu.pipeline_mode<synchronous>, transform_indices = @transform_4, window_bounds = array<i64: 8, 32>}, {pipeline_mode = #tpu.pipeline_mode<synchronous>, transform_indices = @transform_5, window_bounds = array<i64: 64, 32>}, {pipeline_mode = #tpu.pipeline_mode<synchronous>, transform_indices = @transform_6, window_bounds = array<i64: 64, 8>}, {pipeline_mode = #tpu.pipeline_mode<synchronous>, transform_indices = @transform_7, window_bounds = array<i64: 12, 72>}, {transform_indices = @transform_8, window_bounds = array<i64: 12, 8>}]} {
    %c0 = arith.constant 0 : index
    %c0_0 = arith.constant 0 : index
    %0 = vector.load %arg1[%c0, %c0_0] : memref<24x8xf32, #tpu.memory_space<vmem>>, vector<24x8xf32>
    %1 = vector.extract_strided_slice %0 {offsets = [0, 0], sizes = [8, 8], strides = [1, 1]} : vector<24x8xf32> to vector<8x8xf32>
    %2 = vector.extract_strided_slice %0 {offsets = [8, 0], sizes = [8, 8], strides = [1, 1]} : vector<24x8xf32> to vector<8x8xf32>
    %3 = vector.extract_strided_slice %0 {offsets = [16, 0], sizes = [8, 8], strides = [1, 1]} : vector<24x8xf32> to vector<8x8xf32>
    %c0_1 = arith.constant 0 : index
    %c0_2 = arith.constant 0 : index
    %4 = vector.load %arg2[%c0_1, %c0_2] : memref<64x8xf32, #tpu.memory_space<vmem>>, vector<64x8xf32>
    %cst = arith.constant dense<0.000000e+00> : vector<64x8xf32>
    %5 = tpu.matmul %4, %2, %cst {dimension_numbers = #tpu.dot_dimension_numbers<[1], [0], [0], [1], [0, 0, 1, 1], [], []>} : vector<64x8xf32>, vector<8x8xf32>, vector<64x8xf32> -> vector<64x8xf32>
    %c0_3 = arith.constant 0 : index
    %c0_4 = arith.constant 0 : index
    %6 = vector.load %arg3[%c0_3, %c0_4] : memref<192x1xf32, #tpu.memory_space<vmem>>, vector<64x1xf32>
    %7 = vector.broadcast %6 : vector<64x1xf32> to vector<64x8xf32>
    %8 = arith.addf %5, %7 : vector<64x8xf32>
    %9 = math.tanh %8 : vector<64x8xf32>
    %10 = vector.extract_strided_slice %9 {offsets = [0, 0], sizes = [32, 8], strides = [1, 1]} : vector<64x8xf32> to vector<32x8xf32>
    %11 = vector.extract_strided_slice %9 {offsets = [32, 0], sizes = [32, 8], strides = [1, 1]} : vector<64x8xf32> to vector<32x8xf32>
    %c0_5 = arith.constant 0 : index
    %c0_6 = arith.constant 0 : index
    %c0_7 = arith.constant 0 : index
    %12 = vector.load %arg4[%c0_5, %c0_6, %c0_7] : memref<2x32x32xf32, #tpu.memory_space<vmem>>, vector<1x32x32xf32>
    %13 = vector.shape_cast %12 : vector<1x32x32xf32> to vector<32x32xf32>
    %cst_8 = arith.constant dense<0.000000e+00> : vector<32x8xf32>
    %14 = tpu.matmul %13, %10, %cst_8 {dimension_numbers = #tpu.dot_dimension_numbers<[1], [0], [0], [1], [0, 0, 1, 1], [], []>} : vector<32x32xf32>, vector<32x8xf32>, vector<32x8xf32> -> vector<32x8xf32>
    %c64 = arith.constant 64 : index
    %c0_9 = arith.constant 0 : index
    %15 = vector.load %arg3[%c64, %c0_9] : memref<192x1xf32, #tpu.memory_space<vmem>>, vector<32x1xf32>
    %16 = vector.broadcast %15 : vector<32x1xf32> to vector<32x8xf32>
    %17 = arith.addf %14, %16 : vector<32x8xf32>
    %18 = math.tanh %17 : vector<32x8xf32>
    %c1 = arith.constant 1 : index
    %c0_10 = arith.constant 0 : index
    %c0_11 = arith.constant 0 : index
    %19 = vector.load %arg4[%c1, %c0_10, %c0_11] : memref<2x32x32xf32, #tpu.memory_space<vmem>>, vector<1x32x32xf32>
    %20 = vector.shape_cast %19 : vector<1x32x32xf32> to vector<32x32xf32>
    %cst_12 = arith.constant dense<0.000000e+00> : vector<32x8xf32>
    %21 = tpu.matmul %20, %18, %cst_12 {dimension_numbers = #tpu.dot_dimension_numbers<[1], [0], [0], [1], [0, 0, 1, 1], [], []>} : vector<32x32xf32>, vector<32x8xf32>, vector<32x8xf32> -> vector<32x8xf32>
    %c96 = arith.constant 96 : index
    %c0_13 = arith.constant 0 : index
    %22 = vector.load %arg3[%c96, %c0_13] : memref<192x1xf32, #tpu.memory_space<vmem>>, vector<32x1xf32>
    %23 = vector.broadcast %22 : vector<32x1xf32> to vector<32x8xf32>
    %24 = arith.addf %21, %23 : vector<32x8xf32>
    %25 = math.tanh %24 : vector<32x8xf32>
    %c0_14 = arith.constant 0 : index
    %c0_15 = arith.constant 0 : index
    %26 = vector.load %arg5[%c0_14, %c0_15] : memref<8x32xf32, #tpu.memory_space<vmem>>, vector<8x32xf32>
    %cst_16 = arith.constant dense<0.000000e+00> : vector<8x8xf32>
    %27 = tpu.matmul %26, %25, %cst_16 {dimension_numbers = #tpu.dot_dimension_numbers<[1], [0], [0], [1], [0, 0, 1, 1], [], []>} : vector<8x32xf32>, vector<32x8xf32>, vector<8x8xf32> -> vector<8x8xf32>
    %c0_17 = arith.constant 0 : index
    %c0_18 = arith.constant 0 : index
    %28 = vector.load %arg6[%c0_17, %c0_18] : memref<64x32xf32, #tpu.memory_space<vmem>>, vector<64x32xf32>
    %cst_19 = arith.constant dense<0.000000e+00> : vector<64x8xf32>
    %29 = tpu.matmul %28, %11, %cst_19 {dimension_numbers = #tpu.dot_dimension_numbers<[1], [0], [0], [1], [0, 0, 1, 1], [], []>} : vector<64x32xf32>, vector<32x8xf32>, vector<64x8xf32> -> vector<64x8xf32>
    %c128 = arith.constant 128 : index
    %c0_20 = arith.constant 0 : index
    %30 = vector.load %arg3[%c128, %c0_20] : memref<192x1xf32, #tpu.memory_space<vmem>>, vector<64x1xf32>
    %31 = vector.broadcast %30 : vector<64x1xf32> to vector<64x8xf32>
    %32 = arith.addf %29, %31 : vector<64x8xf32>
    %33 = arith.addf %1, %27 : vector<8x8xf32>
    %c0_21 = arith.constant 0 : index
    %c0_22 = arith.constant 0 : index
    %34 = vector.load %arg7[%c0_21, %c0_22] : memref<64x8xf32, #tpu.memory_space<vmem>>, vector<64x8xf32>
    %cst_23 = arith.constant dense<0.000000e+00> : vector<64x8xf32>
    %35 = tpu.matmul %34, %33, %cst_23 {dimension_numbers = #tpu.dot_dimension_numbers<[1], [0], [0], [1], [0, 0, 1, 1], [], []>} : vector<64x8xf32>, vector<8x8xf32>, vector<64x8xf32> -> vector<64x8xf32>
    %36 = arith.mulf %32, %35 : vector<64x8xf32>
    %37 = tpu.concatenate %3, %36 in 0 : vector<8x8xf32>, vector<64x8xf32> -> vector<72x8xf32>
    %c0_24 = arith.constant 0 : index
    %c0_25 = arith.constant 0 : index
    %38 = vector.load %arg8[%c0_24, %c0_25] : memref<12x72xf32, #tpu.memory_space<vmem>>, vector<12x72xf32>
    %cst_26 = arith.constant dense<0.000000e+00> : vector<12x8xf32>
    %39 = tpu.matmul %38, %37, %cst_26 {dimension_numbers = #tpu.dot_dimension_numbers<[1], [0], [0], [1], [0, 0, 1, 1], [], []>} : vector<12x72xf32>, vector<72x8xf32>, vector<12x8xf32> -> vector<12x8xf32>
    %c0_27 = arith.constant 0 : index
    %c0_28 = arith.constant 0 : index
    %40 = vector.load %arg9[%c0_27, %c0_28] : memref<12x8xf32, #tpu.memory_space<vmem>>, vector<12x8xf32>
    tpu.vector_store %arg9[%c0_27, %c0_28], %39 {strides = array<i32>} : memref<12x8xf32, #tpu.memory_space<vmem>>, vector<12x8xf32>,
    return
  }
  func.func @transform_0(%arg0: i32) -> (i32, i32) {
    %c0_i32 = arith.constant 0 : i32
    %c0_i32_0 = arith.constant 0 : i32
    return %c0_i32, %arg0 : i32, i32
  }
  func.func @transform_1(%arg0: i32) -> (i32, i32) {
    %c0_i32 = arith.constant 0 : i32
    %c0_i32_0 = arith.constant 0 : i32
    %c0_i32_1 = arith.constant 0 : i32
    return %c0_i32, %c0_i32_0 : i32, i32
  }
  func.func @transform_2(%arg0: i32) -> (i32, i32) {
    %c0_i32 = arith.constant 0 : i32
    %c0_i32_0 = arith.constant 0 : i32
    %c0_i32_1 = arith.constant 0 : i32
    return %c0_i32, %c0_i32_0 : i32, i32
  }
  func.func @transform_3(%arg0: i32) -> (i32, i32, i32) {
    %c0_i32 = arith.constant 0 : i32
    %c0_i32_0 = arith.constant 0 : i32
    %c0_i32_1 = arith.constant 0 : i32
    %c0_i32_2 = arith.constant 0 : i32
    return %c0_i32, %c0_i32_0, %c0_i32_1 : i32, i32, i32
  }
  func.func @transform_4(%arg0: i32) -> (i32, i32) {
    %c0_i32 = arith.constant 0 : i32
    %c0_i32_0 = arith.constant 0 : i32
    %c0_i32_1 = arith.constant 0 : i32
    return %c0_i32, %c0_i32_0 : i32, i32
  }
  func.func @transform_5(%arg0: i32) -> (i32, i32) {
    %c0_i32 = arith.constant 0 : i32
    %c0_i32_0 = arith.constant 0 : i32
    %c0_i32_1 = arith.constant 0 : i32
    return %c0_i32, %c0_i32_0 : i32, i32
  }
  func.func @transform_6(%arg0: i32) -> (i32, i32) {
    %c0_i32 = arith.constant 0 : i32
    %c0_i32_0 = arith.constant 0 : i32
    %c0_i32_1 = arith.constant 0 : i32
    return %c0_i32, %c0_i32_0 : i32, i32
  }
  func.func @transform_7(%arg0: i32) -> (i32, i32) {
    %c0_i32 = arith.constant 0 : i32
    %c0_i32_0 = arith.constant 0 : i32
    %c0_i32_1 = arith.constant 0 : i32
    return %c0_i32, %c0_i32_0 : i32, i32
  }
  func.func @transform_8(%arg0: i32) -> (i32, i32) {
    %c0_i32 = arith.constant 0 : i32
    %c0_i32_0 = arith.constant 0 : i32
    return %c0_i32, %arg0 : i32, i32
  }
}

</mosaic_0001>

<bundles_post_ra>
// kernel: tpu_custom_call.1
= control target key start
LH: loop header
LB: loop body
LE: loop exit
PB: predicated region body
PF: predicated region fallthrough
CT: control target
= control target key end

     0   :  { %vm88_vm0 = vcmask 64512   ;;  %v1230_v3 = vmov 0   ;;  %vm254_vm1 = vcmask 261120   ;;  %vm1232_vm2 = vmmov 0   ;;  %s1518_s0 = inlined_call_operand.vmem [shape: f32[24,8], index: 0, kind: input, shape index: {}]   ;;  %s1519_s1 = inlined_call_operand.vmem [shape: f32[64,8], index: 1, kind: input, shape index: {}]   ;;  %s1520_s2 = inlined_call_operand.vmem [shape: f32[192,1], index: 2, kind: input, shape index: {}]   ;;  %s1521_s3 = inlined_call_operand.vmem [shape: f32[2,32,32], index: 3, kind: input, shape index: {}]   ;;  %s1522_s5 = inlined_call_operand.vmem [shape: f32[64,32], index: 5, kind: input, shape index: {}]   ;;  %s1523_s4 = inlined_call_operand.vmem [shape: f32[8,32], index: 4, kind: input, shape index: {}]   ;;  %s1524_s6 = inlined_call_operand.vmem [shape: f32[64,8], index: 6, kind: input, shape index: {}]   ;;  %s1525_s7 = inlined_call_operand.vmem [shape: f32[12,72], index: 7, kind: input, shape index: {}]   ;;  %s1526_s8 = inlined_call_operand.vmem [shape: f32[12,8], index: 8, kind: output, shape index: {}]  }
   0x1   :  { %v30_v0 = vld [vmem:[%s1518_s0 + $0x8] sm:$0xff]  ;;  %v32_v1 = vld [vmem:[%s1519_s1] sm:$0xff]  ;;  %1196 = vset.pattern.permute.xlu0 %v1230_v3  ;;  %1197 = vset.pattern.permute.xlu1 %v1230_v3  ;;  %v34_v6 = vld [vmem:[%s1519_s1 + $0x10] sm:$0xff]  ;;  %vm893_vm3 = vcmask 588800   ;;  %vm976_vm4 = vcmask 60416  }
   0x2   :  { %v36_v2 = vld [vmem:[%s1519_s1 + $0x20] sm:$0xff]  ;;  %1083 = vmatprep.subr.mxu0 %v30_v0  ;;  %1191 = vmatprep.subr.mxu1 %v30_v0  ;;  %v33_v4 = vld [vmem:[%s1519_s1 + $0x8] sm:$0xff]  ;;  %v38_v7 = vld [vmem:[%s1519_s1 + $0x30] sm:$0xff] }
   0x3   :  { %v37_v5 = vld [vmem:[%s1519_s1 + $0x28] sm:$0xff]  ;;  %1084 = vmatpush3.msra.mxu0 %v30_v0  ;;  %1192 = vmatpush3.msra.mxu1 %v30_v0  ;;  %v43_v8 = vld [vmem:[%s1520_s2 + $0x18] sm:$0xff]  ;;  %v42_v12 = vld [vmem:[%s1520_s2 + $0x10] sm:$0xff] }
   0x4   :  { %1085 = vmatprep.mubr.msk.f32.mxu0 %vm88_vm0, %v32_v1  ;;  %1091 = vmatprep.mubr.msk.f32.mxu1 %vm88_vm0, %v36_v2  ;;  %v41_v9 = vld [vmem:[%s1520_s2 + $0x8] sm:$0xff]  ;;  %v35_v10 = vld [vmem:[%s1519_s1 + $0x18] sm:$0xff]  ;;  %v40_v13 = vld [vmem:[%s1520_s2] sm:$0xff] }
   0x5   :  { %1086 = vmatmul.mubr.msk.f32.vlgmr.msra.gmra.mxu0 %vm88_vm0, %v33_v4  ;;  %1092 = vmatmul.mubr.msk.f32.vlgmr.msra.gmra.mxu1 %vm88_vm0, %v37_v5  ;;  %v39_v11 = vld [vmem:[%s1519_s1 + $0x38] sm:$0xff]  ;;  %v232_v15 = vld [vmem:[%s1520_s2 + $0x50] sm:$0xff]  ;;  %v231_v16 = vld [vmem:[%s1520_s2 + $0x48] sm:$0xff] }
   0x6   :  { %1088 = vmatprep.mubr.msk.f32.mxu0 %vm88_vm0, %v34_v6  ;;  %1094 = vmatprep.mubr.msk.f32.mxu1 %vm88_vm0, %v38_v7  ;;  %v233_v14 = vld [vmem:[%s1520_s2 + $0x58] sm:$0xff]  ;;  %v230_v17 = vld [vmem:[%s1520_s2 + $0x40] sm:$0xff]  ;;  %v363_v19 = vld [vmem:[%s1520_s2 + $0x70] sm:$0xff] }
   0x7   :  { %65 = vperm.xlu0 %1196, %v43_v8   ;;  %55 = vperm.xlu1 %1197, %v41_v9   ;;  %v364_v18 = vld [vmem:[%s1520_s2 + $0x78] sm:$0xff]  ;;  %v362_v20 = vld [vmem:[%s1520_s2 + $0x68] sm:$0xff]  ;;  %v361_v21 = vld [vmem:[%s1520_s2 + $0x60] sm:$0xff] }
   0x8   :  { %v47_v22 = vld [vmem:[%s1520_s2 + $0x38] sm:$0xff]  ;;  %v46_v23 = vld [vmem:[%s1520_s2 + $0x30] sm:$0xff]  ;;  %v45_v24 = vld [vmem:[%s1520_s2 + $0x28] sm:$0xff] }
   0x9   :  { %1089 = vmatmul.mubr.msk.f32.gmra.mxu0 %vm88_vm0, %v35_v10  ;;  %1095 = vmatmul.mubr.msk.f32.gmra.mxu1 %vm88_vm0, %v39_v11  ;;  %v44_v25 = vld [vmem:[%s1520_s2 + $0x20] sm:$0xff]  ;;  %v575_v26 = vld [vmem:[%s1520_s2 + $0xb8] sm:$0xff]  ;;  %v574_v27 = vld [vmem:[%s1520_s2 + $0xb0] sm:$0xff] }
   0xa   :  { %v573_v28 = vld [vmem:[%s1520_s2 + $0xa8] sm:$0xff]  ;;  %v572_v29 = vld [vmem:[%s1520_s2 + $0xa0] sm:$0xff]  ;;  %v571_v30 = vld [vmem:[%s1520_s2 + $0x98] sm:$0xff] }
   0xb   :  { %60 = vperm.xlu0 %1196, %v42_v12   ;;  %50 = vperm.xlu1 %1197, %v40_v13   ;;  %v570_v31 = vld [vmem:[%s1520_s2 + $0x90] sm:$0xff]  ;;  %v569_v32 = vld [vmem:[%s1520_s2 + $0x88] sm:$0xff]  ;;  %v568_v33 = vld [vmem:[%s1520_s2 + $0x80] sm:$0xff] }
   0xc   :  { %v226_v34 = vld [vmem:[%s1521_s3] sm:$0xff]  ;;  %v227_v51 = vld [vmem:[%s1521_s3 + $0x8] sm:$0xff]  ;;  %v228_v52 = vld [vmem:[%s1521_s3 + $0x10] sm:$0xff] }
   0xd   :  { %1105 = vmatprep.mubr.msk.f32.mxu1 %vm254_vm1, %v226_v34  ;;  %v229_v53 = vld [vmem:[%s1521_s3 + $0x18] sm:$0xff]  ;;  %v994_v54 = vld [vmem:[%s1521_s3 + $0x20] sm:$0xff] }
   0xe   :  { %v564_v34 = vld [vmem:[%s1522_s5 + $0x20] sm:$0xff] }
   0xf   :  { %251 = vperm.xlu0 %1196, %v233_v14   ;;  %246 = vperm.xlu1 %1197, %v232_v15  }
  0x13   :  { %241 = vperm.xlu0 %1196, %v231_v16   ;;  %236 = vperm.xlu1 %1197, %v230_v17  }
  0x17   :  { %382 = vperm.xlu0 %1196, %v364_v18   ;;  %377 = vperm.xlu1 %1197, %v363_v19  }
  0x1b   :  { %372 = vperm.xlu0 %1196, %v362_v20   ;;  %367 = vperm.xlu1 %1197, %v361_v21  }
  0x1f   :  { %85 = vperm.xlu0 %1196, %v47_v22   ;;  %80 = vperm.xlu1 %1197, %v46_v23   ;;  %v995_v23 = vld [vmem:[%s1521_s3 + $0x28] sm:$0xff] }
  0x23   :  { %75 = vperm.xlu0 %1196, %v45_v24   ;;  %70 = vperm.xlu1 %1197, %v44_v25   ;;  %v996_v24 = vld [vmem:[%s1521_s3 + $0x30] sm:$0xff] }
  0x27   :  { %613 = vperm.xlu0 %1196, %v575_v26   ;;  %608 = vperm.xlu1 %1197, %v574_v27   ;;  %v997_v27 = vld [vmem:[%s1521_s3 + $0x38] sm:$0xff] }
  0x2b   :  { %603 = vperm.xlu0 %1196, %v573_v28   ;;  %598 = vperm.xlu1 %1197, %v572_v29   ;;  %v560_v28 = vld [vmem:[%s1522_s5] sm:$0xff] }
  0x2f   :  { %593 = vperm.xlu0 %1196, %v571_v30   ;;  %588 = vperm.xlu1 %1197, %v570_v31   ;;  %v561_v31 = vld [vmem:[%s1522_s5 + $0x8] sm:$0xff] }
  0x33   :  { %583 = vperm.xlu0 %1196, %v569_v32   ;;  %578 = vperm.xlu1 %1197, %v568_v33   ;;  %v562_v32 = vld [vmem:[%s1522_s5 + $0x10] sm:$0xff]  ;;  %v563_v33 = vld [vmem:[%s1522_s5 + $0x18] sm:$0xff] }
  0x82   :  { %v66_v35 = vpop.permute.xlu0 %65  ;;  %v56_v37 = vpop.permute.xlu1 %55 }
  0x86   :  { %v61_v41 = vpop.permute.xlu0 %60  ;;  %v51_v45 = vpop.permute.xlu1 %50 }
  0x8a   :  { %v252_v55 = vpop.permute.xlu0 %251  ;;  %v247_v56 = vpop.permute.xlu1 %246 }
  0x8e   :  { %v242_v58 = vpop.permute.xlu0 %241  ;;  %v237_v60 = vpop.permute.xlu1 %236 }
  0x92   :  { %v1405_v62 = vpop.permute.xlu0 %382  ;;  %v1407_v63 = vpop.permute.xlu1 %377 }
  0x96   :  { %v1409_v2 = vpop.permute.xlu0 %372  ;;  %v1411_v4 = vpop.permute.xlu1 %367 }
  0x9a   :  { %v86_v10 = vpop.permute.xlu0 %85  ;;  %v81_v12 = vpop.permute.xlu1 %80 }
  0x9e   :  { %v76_v15 = vpop.permute.xlu0 %75  ;;  %v71_v17 = vpop.permute.xlu1 %70 }
  0xc5   :  { %v1087_v36 = vpop.f32.mrf.mxu0  ;;  %v1093_v57 = vpop.f32.mrf.mxu1 }
  0xc6   :  { %v185_v43 = vadd.f32 %v1087_v36, %v56_v37  ;;  %v205_v16 = vadd.f32 %v1093_v57, %v76_v15  ;;  %v566_v36 = vld [vmem:[%s1522_s5 + $0x30] sm:$0xff]  ;;  %v567_v37 = vld [vmem:[%s1522_s5 + $0x38] sm:$0xff]  ;;  %v747_v57 = vld [vmem:[%s1524_s6 + $0x8] sm:$0xff] }
  0xc7   :  { %v179_v38 = vpop.f32.mrf.mxu0  ;;  %v199_v59 = vpop.f32.mrf.mxu1 }
  0xc8   :  { %v180_v46 = vadd.f32 %v179_v38, %v51_v45  ;;  %v200_v18 = vadd.f32 %v199_v59, %v71_v17  ;;  %v1231_v38 = vmov 0.0   ;;  %v749_v59 = vld [vmem:[%s1524_s6 + $0x18] sm:$0xff] }
  0xc9   :  { %v1090_v39 = vpop.f32.mrf.mxu0  ;;  %v1096_v61 = vpop.f32.mrf.mxu1  ;;  %1125 = vmatprep.subr.mxu0 %v1231_v38  ;;  %1133 = vmatprep.mubr.msk.f32.mxu0 %vm1232_vm2, %v1231_v38 }
  0xca   :  { %v195_v40 = vadd.f32 %v1090_v39, %v66_v35  ;;  %v215_v13 = vadd.f32 %v1096_v61, %v86_v10  ;;  %v565_v35 = vld [vmem:[%s1522_s5 + $0x28] sm:$0xff] }
  0xcb   :  { %v189_v42 = vpop.f32.mrf.mxu0  ;;  %v209_v0 = vpop.f32.mrf.mxu1  ;;  %v751_v61 = vld [vmem:[%s1524_s6 + $0x28] sm:$0xff] }
  0xcc   :  { %1198 = vtanh.f32 %v195_v40  ;;  %v190_v44 = vadd.f32 %v189_v42, %v61_v41  ;;  %v210_v14 = vadd.f32 %v209_v0, %v81_v12  ;;  %v891_v0 = vld [vmem:[%s1525_s7] sm:$0xff] }
  0xce   :  { %1200 = vtanh.f32 %v190_v44 }
  0xcf   :  { %1202 = vtanh.f32 %v185_v43 }
  0xd0   :  { %1204 = vtanh.f32 %v180_v46 }
  0xd9   :  { %v1199_v47 = vpop.eup %1198 }
  0xda   :  { %1097 = vmatprep.subr.mxu1 %v1199_v47 }
  0xdb   :  { %v1201_v48 = vpop.eup %1200  ;;  %1098 = vmatpush3.msra.mxu1 %v1199_v47 }
  0xdc   :  { %1099 = vmatprep.subr.mxu1 %v1201_v48  ;;  %v1203_v49 = vpop.eup %1202 }
  0xdd   :  { %1100 = vmatpush3.msra.mxu1 %v1201_v48  ;;  %v1205_v50 = vpop.eup %1204 }
  0xde   :  { %1101 = vmatprep.subr.mxu1 %v1203_v49 }
  0xdf   :  { %1102 = vmatpush3.msra.mxu1 %v1203_v49 }
  0xe0   :  { %1103 = vmatprep.subr.mxu1 %v1205_v50 }
  0xe1   :  { %1104 = vmatpush3.msra.mxu1 %v1205_v50  ;;  %v486_v50 = vld [vmem:[%s1523_s4] sm:$0xff] }
  0xe2   :  { %1106 = vmatmul.mubr.msk.f32.vlgmr.msra.gmra.mxu1 %vm254_vm1, %v227_v51 }
  0xe3   :  { %1108 = vmatprep.mubr.msk.f32.mxu1 %vm254_vm1, %v228_v52  ;;  %v746_v52 = vld [vmem:[%s1524_s6] sm:$0xff] }
  0xe6   :  { %1109 = vmatmul.mubr.msk.f32.gmra.mxu1 %vm254_vm1, %v229_v53  ;;  %v29_v53 = vld [vmem:[%s1518_s0] sm:$0xff] }
  0xe7   :  { %1119 = vmatprep.mubr.msk.f32.mxu1 %vm254_vm1, %v994_v54 }
 0x1a2   :  { %v1107_v1 = vpop.f32.mrf.mxu1 }
 0x1a3   :  { %v339_v8 = vadd.f32 %v1107_v1, %v242_v58  ;;  %v748_v58 = vld [vmem:[%s1524_s6 + $0x10] sm:$0xff] }
 0x1a4   :  { %v333_v3 = vpop.f32.mrf.mxu1 }
 0x1a5   :  { %v334_v11 = vadd.f32 %v333_v3, %v237_v60  ;;  %v750_v60 = vld [vmem:[%s1524_s6 + $0x20] sm:$0xff] }
 0x1a6   :  { %v1110_v5 = vpop.f32.mrf.mxu1 }
 0x1a7   :  { %v349_v6 = vadd.f32 %v1110_v5, %v252_v55 }
 0x1a8   :  { %v343_v7 = vpop.f32.mrf.mxu1 }
 0x1a9   :  { %1206 = vtanh.f32 %v349_v6  ;;  %v344_v9 = vadd.f32 %v343_v7, %v247_v56 }
 0x1ab   :  { %1208 = vtanh.f32 %v344_v9  ;;  %v614_v9 = vpop.permute.xlu0 %613 }
 0x1ac   :  { %1210 = vtanh.f32 %v339_v8 }
 0x1ad   :  { %1212 = vtanh.f32 %v334_v11  ;;  %v609_v11 = vpop.permute.xlu1 %608 }
 0x1ae   :  { %1214 = vtanh.f32 %v215_v13 }
 0x1af   :  { %1216 = vtanh.f32 %v210_v14  ;;  %v604_v15 = vpop.permute.xlu0 %603 }
 0x1b0   :  { %1218 = vtanh.f32 %v205_v16 }
 0x1b1   :  { %1220 = vtanh.f32 %v200_v18 }
 0x1b6   :  { %v1207_v19 = vpop.eup %1206 }
 0x1b7   :  { %1111 = vmatprep.subr.mxu1 %v1207_v19 }
 0x1b8   :  { %v1209_v20 = vpop.eup %1208  ;;  %1112 = vmatpush3.msra.mxu1 %v1207_v19  ;;  %v599_v19 = vpop.permute.xlu1 %598 }
 0x1b9   :  { %1113 = vmatprep.subr.mxu1 %v1209_v20  ;;  %v1211_v21 = vpop.eup %1210 }
 0x1ba   :  { %1114 = vmatpush3.msra.mxu1 %v1209_v20  ;;  %v1213_v22 = vpop.eup %1212 }
 0x1bb   :  { %1115 = vmatprep.subr.mxu1 %v1211_v21  ;;  %v1215_v25 = vpop.eup %1214 }
 0x1bc   :  { %1116 = vmatpush3.msra.mxu1 %v1211_v21  ;;  %v1217_v26 = vpop.eup %1216 }
 0x1bd   :  { %1117 = vmatprep.subr.mxu1 %v1213_v22  ;;  %v1219_v29 = vpop.eup %1218 }
 0x1be   :  { %1118 = vmatpush3.msra.mxu1 %v1213_v22  ;;  %v1221_v30 = vpop.eup %1220 }
 0x1bf   :  { %1120 = vmatmul.mubr.msk.f32.vlgmr.msra.gmra.mxu1 %vm254_vm1, %v995_v23  ;;  %1136 = vmatprep.subr.mxu1 %v1215_v25 }
 0x1c0   :  { %1137 = vmatpush3.msra.mxu1 %v1215_v25  ;;  %1122 = vmatprep.mubr.msk.f32.mxu1 %vm254_vm1, %v996_v24 }
 0x1c1   :  { %1138 = vmatprep.subr.mxu1 %v1217_v26 }
 0x1c2   :  { %1139 = vmatpush3.msra.mxu1 %v1217_v26  ;;  %v594_v26 = vpop.permute.xlu0 %593 }
 0x1c3   :  { %1123 = vmatmul.mubr.msk.f32.gmra.mxu1 %vm254_vm1, %v997_v27  ;;  %1140 = vmatprep.subr.mxu1 %v1219_v29 }
 0x1c4   :  { %1141 = vmatpush3.msra.mxu1 %v1219_v29  ;;  %1144 = vmatprep.mubr.msk.f32.mxu1 %vm254_vm1, %v560_v28  ;;  %v589_v29 = vpop.permute.xlu1 %588 }
 0x1c5   :  { %1142 = vmatprep.subr.mxu1 %v1221_v30 }
 0x1c6   :  { %1143 = vmatpush3.msra.mxu1 %v1221_v30 }
 0x1c7   :  { %1145 = vmatmul.mubr.msk.f32.vlgmr.msra.gmra.mxu1 %vm254_vm1, %v561_v31 }
 0x1c8   :  { %1147 = vmatprep.mubr.msk.f32.mxu1 %vm254_vm1, %v562_v32 }
 0x1cb   :  { %1148 = vmatmul.mubr.msk.f32.gmra.mxu1 %vm254_vm1, %v563_v33 }
 0x1cc   :  { %1150 = vmatprep.mubr.msk.f32.mxu1 %vm254_vm1, %v564_v34  ;;  %v584_v34 = vpop.permute.xlu0 %583 }
 0x1cf   :  { %1151 = vmatmul.mubr.msk.f32.gmra.mxu1 %vm254_vm1, %v565_v35 }
 0x1d0   :  { %1153 = vmatprep.mubr.msk.f32.mxu1 %vm254_vm1, %v566_v36 }
 0x1d3   :  { %1154 = vmatmul.mubr.msk.f32.gmra.mxu1 %vm254_vm1, %v567_v37  ;;  %v579_v37 = vpop.permute.xlu1 %578 }
 0x27f   :  { %v1121_v39 = vpop.f32.mrf.mxu1 }
 0x280   :  { %v469_v44 = vadd.f32 %v1121_v39, %v1409_v2 }
 0x281   :  { %v463_v40 = vpop.f32.mrf.mxu1 }
 0x282   :  { %v464_v46 = vadd.f32 %v463_v40, %v1411_v4 }
 0x283   :  { %v1124_v41 = vpop.f32.mrf.mxu1 }
 0x284   :  { %v479_v42 = vadd.f32 %v1124_v41, %v1405_v62  ;;  %v752_v62 = vld [vmem:[%s1524_s6 + $0x30] sm:$0xff] }
 0x285   :  { %v473_v43 = vpop.f32.mrf.mxu1  ;;  %v31_v41 = vld [vmem:[%s1518_s0 + $0x10] sm:$0xff] }
 0x286   :  { %1222 = vtanh.f32 %v479_v42  ;;  %v474_v45 = vadd.f32 %v473_v43, %v1407_v63  ;;  %v753_v63 = vld [vmem:[%s1524_s6 + $0x38] sm:$0xff]  ;;  %v892_v42 = vld [vmem:[%s1525_s7 + $0x8] sm:$0xf] }
 0x287   :  { %v1146_v1 = vpop.f32.mrf.mxu1 }
 0x288   :  { %1224 = vtanh.f32 %v474_v45  ;;  %v712_v35 = vadd.f32 %v1146_v1, %v584_v34 }
 0x289   :  { %1226 = vtanh.f32 %v469_v44  ;;  %v706_v2 = vpop.f32.mrf.mxu1 }
 0x28a   :  { %1228 = vtanh.f32 %v464_v46 }
 0x28b   :  { %v1149_v3 = vpop.f32.mrf.mxu1 }
 0x28c   :  { %v722_v30 = vadd.f32 %v1149_v3, %v594_v26 }
 0x28d   :  { %v716_v4 = vpop.f32.mrf.mxu1 }
 0x28e   :  { %v717_v32 = vadd.f32 %v716_v4, %v589_v29 }
 0x28f   :  { %v1152_v5 = vpop.f32.mrf.mxu1 }
 0x290   :  { %v732_v24 = vadd.f32 %v1152_v5, %v604_v15 }
 0x291   :  { %v726_v7 = vpop.f32.mrf.mxu1 }
 0x292   :  { %v727_v27 = vadd.f32 %v726_v7, %v599_v19 }
 0x293   :  { %v1223_v47 = vpop.eup %1222  ;;  %v1155_v12 = vpop.f32.mrf.mxu1 }
 0x294   :  { %1126 = vmatpush3.msra.mxu0 %v1223_v47  ;;  %v742_v18 = vadd.f32 %v1155_v12, %v614_v9 }
 0x295   :  { %v1225_v48 = vpop.eup %1224  ;;  %1127 = vmatprep.subr.mxu0 %v1231_v38  ;;  %v736_v16 = vpop.f32.mrf.mxu1 }
 0x296   :  { %1128 = vmatpush3.msra.mxu0 %v1225_v48  ;;  %v1227_v49 = vpop.eup %1226  ;;  %v737_v21 = vadd.f32 %v736_v16, %v609_v11 }
 0x297   :  { %1129 = vmatprep.subr.mxu0 %v1231_v38  ;;  %v1229_v51 = vpop.eup %1228 }
 0x298   :  { %1130 = vmatpush3.msra.mxu0 %v1227_v49 }
 0x299   :  { %1131 = vmatprep.subr.mxu0 %v1231_v38  ;;  %v707_v38 = vadd.f32 %v706_v2, %v579_v37 }
 0x29a   :  { %1132 = vmatpush3.msra.mxu0 %v1229_v51 }
 0x29b   :  { %1134 = vmatmul.mubr.msk.f32.vlgmr.msra.gmra.mxu0 %vm254_vm1, %v486_v50 }
 0x29c   :  { %1158 = vmatprep.mubr.msk.f32.mxu0 %vm88_vm0, %v746_v52 }
 0x35b   :  { %v556_v54 = vpop.f32.mrf.mxu0 }
 0x35c   :  { %v745_v55 = vadd.f32 %v556_v54, %v29_v53 }
 0x35d   :  { %v1135_v56 = vpop.f32.mrf.mxu0 }
 0x35e   :  { %1156 = vmatprep.subr.mxu0 %v745_v55 }
 0x35f   :  { %1157 = vmatpush3.msra.mxu0 %v745_v55 }
 0x360   :  { %1159 = vmatmul.mubr.msk.f32.vlgmr.msra.gmra.mxu0 %vm88_vm0, %v747_v57 }
 0x361   :  { %1161 = vmatprep.mubr.msk.f32.mxu0 %vm88_vm0, %v748_v58 }
 0x364   :  { %1162 = vmatmul.mubr.msk.f32.gmra.mxu0 %vm88_vm0, %v749_v59 }
 0x365   :  { %1164 = vmatprep.mubr.msk.f32.mxu0 %vm88_vm0, %v750_v60 }
 0x368   :  { %1165 = vmatmul.mubr.msk.f32.gmra.mxu0 %vm88_vm0, %v751_v61 }
 0x369   :  { %1167 = vmatprep.mubr.msk.f32.mxu0 %vm88_vm0, %v752_v62 }
 0x36c   :  { %1168 = vmatmul.mubr.msk.f32.gmra.mxu0 %vm88_vm0, %v753_v63 }
 0x36d   :  { %1188 = vmatprep.mubr.msk.f32.mxu0 %vm893_vm3, %v891_v0 }
 0x420   :  { %v1160_v6 = vpop.f32.mrf.mxu0 }
 0x421   :  { %v884_v39 = vmul.f32 %v1160_v6, %v712_v35 }
 0x422   :  { %v844_v8 = vpop.f32.mrf.mxu0 }
 0x423   :  { %v883_v40 = vmul.f32 %v844_v8, %v707_v38 }
 0x424   :  { %v1163_v10 = vpop.f32.mrf.mxu0 }
 0x425   :  { %v886_v33 = vmul.f32 %v1163_v10, %v722_v30 }
 0x426   :  { %v854_v13 = vpop.f32.mrf.mxu0 }
 0x427   :  { %v885_v36 = vmul.f32 %v854_v13, %v717_v32 }
 0x428   :  { %v1166_v14 = vpop.f32.mrf.mxu0 }
 0x429   :  { %v888_v28 = vmul.f32 %v1166_v14, %v732_v24 }
 0x42a   :  { %v864_v17 = vpop.f32.mrf.mxu0 }
 0x42b   :  { %v887_v31 = vmul.f32 %v864_v17, %v727_v27 }
 0x42c   :  { %v1169_v20 = vpop.f32.mrf.mxu0 }
 0x42d   :  { %v890_v22 = vmul.f32 %v1169_v20, %v742_v18 }
 0x42e   :  { %v874_v23 = vpop.f32.mrf.mxu0 }
 0x42f   :  { %v889_v25 = vmul.f32 %v874_v23, %v737_v21  ;;  %1170 = vmatprep.subr.mxu0 %v890_v22 }
 0x430   :  { %1171 = vmatpush3.msra.mxu0 %v890_v22 }
 0x431   :  { %1172 = vmatprep.subr.mxu0 %v889_v25 }
 0x432   :  { %1173 = vmatpush3.msra.mxu0 %v889_v25 }
 0x433   :  { %1174 = vmatprep.subr.mxu0 %v888_v28 }
 0x434   :  { %1175 = vmatpush3.msra.mxu0 %v888_v28 }
 0x435   :  { %1176 = vmatprep.subr.mxu0 %v887_v31 }
 0x436   :  { %1177 = vmatpush3.msra.mxu0 %v887_v31 }
 0x437   :  { %1178 = vmatprep.subr.mxu0 %v886_v33 }
 0x438   :  { %1179 = vmatpush3.msra.mxu0 %v886_v33 }
 0x439   :  { %1180 = vmatprep.subr.mxu0 %v885_v36 }
 0x43a   :  { %1181 = vmatpush3.msra.mxu0 %v885_v36 }
 0x43b   :  { %1182 = vmatprep.subr.mxu0 %v884_v39 }
 0x43c   :  { %1183 = vmatpush3.msra.mxu0 %v884_v39 }
 0x43d   :  { %1184 = vmatprep.subr.mxu0 %v883_v40 }
 0x43e   :  { %1185 = vmatpush3.msra.mxu0 %v883_v40 }
 0x43f   :  { %1186 = vmatprep.subr.mxu0 %v31_v41 }
 0x440   :  { %1187 = vmatpush3.msra.mxu0 %v31_v41 }
 0x441   :  { %1189 = vmatmul.mubr.msk.f32.vlgmr.msra.gmra.mxu0 %vm893_vm3, %v892_v42 }
 0x501   :  { %v1190_v43 = vpop.f32.mrf.mxu0 }
 0x502   :  { %977 = vst.msk [vmem:[%s1526_s8 + $0x8] sm:$0xf] %vm976_vm4, %v1190_v43 }
 0x503   :  { %v966_v44 = vpop.f32.mrf.mxu0 }
 0x504   :  { %975 = vst.msk [vmem:[%s1526_s8] sm:$0xff] %vm88_vm0, %v966_v44 }

</bundles_post_ra>
